<compile_context>
chip_gen: v7x
topology: tpu7x:2x2x1
jax: 0.10.0
libtpu: 0.0.40
codegen_flags: <defaults>
</compile_context>

<pallas_src>
import math
import jax
import jax.numpy as jnp
from jax.experimental import pallas as pl
from jax.experimental.pallas import tpu as pltpu

F32 = jnp.float32
NEG = -1e30  # finite "-inf": exp(NEG - m) underflows to exactly 0.0 in f32 (no NaN risk)


# ----------------------------------------------------------------------------
# Small dense kernels (single full-array block; shapes here are tiny).
# TODO(synk): for production sizes, row-tile these over M (512-row tiles) and set
#             vmem_limit_bytes / re-derive tiles for v7x's 64 MiB VMEM.
# ----------------------------------------------------------------------------
def _matmul_kernel(x_ref, w_ref, o_ref):
    o_ref[...] = jax.lax.dot_general(
        x_ref[...], w_ref[...], (((1,), (0,)), ((), ())),
        preferred_element_type=F32)


def matmul(x, w):
    M, K = x.shape
    N = w.shape[1]
    return pl.pallas_call(
        _matmul_kernel,
        out_shape=jax.ShapeDtypeStruct((M, N), F32),
        grid=(1,),
        in_specs=[pl.BlockSpec((M, K), lambda i: (0, 0)),
                  pl.BlockSpec((K, N), lambda i: (0, 0))],
        out_specs=pl.BlockSpec((M, N), lambda i: (0, 0)),
    )(x, w)


def _linear_kernel(x_ref, w_ref, b_ref, o_ref):
    o_ref[...] = (jax.lax.dot_general(x_ref[...], w_ref[...],
                                      (((1,), (0,)), ((), ())),
                                      preferred_element_type=F32)
                  + b_ref[...])


def linear(x, w, b):
    M, K = x.shape
    N = w.shape[1]
    return pl.pallas_call(
        _linear_kernel,
        out_shape=jax.ShapeDtypeStruct((M, N), F32),
        grid=(1,),
        in_specs=[pl.BlockSpec((M, K), lambda i: (0, 0)),
                  pl.BlockSpec((K, N), lambda i: (0, 0)),
                  pl.BlockSpec((1, N), lambda i: (0, 0))],
        out_specs=pl.BlockSpec((M, N), lambda i: (0, 0)),
    )(x, w, b)


# ----------------------------------------------------------------------------
# Fused BatchNorm1d -> FF(ReLU) -> skip -> BatchNorm1d kernel.
# BatchNorm uses training-mode batch statistics (biased variance, eps=1e-5), matching the
# default state of the PyTorch module (no running stats / eval mode implemented).
# ----------------------------------------------------------------------------
def _bn_ff_bn_kernel(x_ref, g1_ref, b1_ref, w1_ref, bb1_ref, w2_ref, bb2_ref,
                     g2_ref, b2_ref, o_ref):
    def bn(x, g, b):
        mean = jnp.mean(x, axis=0, keepdims=True)
        var = jnp.mean((x - mean) ** 2, axis=0, keepdims=True)
        return (x - mean) * jax.lax.rsqrt(var + 1e-5) * g + b

    def dot(a, b):
        return jax.lax.dot_general(a, b, (((1,), (0,)), ((), ())),
                                   preferred_element_type=F32)

    x = x_ref[...]
    h1 = bn(x, g1_ref[...], b1_ref[...])                     # BN1 of (h + MHA(h))
    hh = jnp.maximum(dot(h1, w1_ref[...]) + bb1_ref[...], 0.0)
    y = h1 + dot(hh, w2_ref[...]) + bb2_ref[...]             # SkipConnection(FF)
    o_ref[...] = bn(y, g2_ref[...], b2_ref[...])             # BN2


def bn_ff_bn(x, g1, b1, w1, bb1, w2, bb2, g2, b2):
    M, E = x.shape
    F = w1.shape[1]
    vec_e = pl.BlockSpec((1, E), lambda i: (0, 0))
    vec_f = pl.BlockSpec((1, F), lambda i: (0, 0))
    return pl.pallas_call(
        _bn_ff_bn_kernel,
        out_shape=jax.ShapeDtypeStruct((M, E), F32),
        grid=(1,),
        in_specs=[pl.BlockSpec((M, E), lambda i: (0, 0)),
                  vec_e, vec_e,
                  pl.BlockSpec((E, F), lambda i: (0, 0)), vec_f,
                  pl.BlockSpec((F, E), lambda i: (0, 0)), vec_e,
                  vec_e, vec_e],
        out_specs=pl.BlockSpec((M, E), lambda i: (0, 0)),
    )(x, g1, b1, w1, bb1, w2, bb2, g2, b2)


# ----------------------------------------------------------------------------
# Heterogeneous attention kernel, grid=(B,).
# Inputs per step:
#   qkv_ref : (9, H, 1, G, dk)  -- all 9 projections x all heads for this batch element
#   h_ref   : (1, G, E)         -- residual input
#   wout_ref: (H*dk, E)         -- output projection (constant block, stays resident)
# Output:
#   o_ref   : (1, G, E)         -- h + MHA(h), lane-dense E
#
# Per-row merging (identical to the reference semantics):
#   pick rows (1..P)      use queries (W1, W2, W3) against (paired delivery, all picks, all deliveries)
#   delivery rows (P+1..) use queries (W4, W6, W5) against (paired pick,     all picks, all deliveries)
#   depot row (0)         gets only the plain graph attention (all extra columns were -inf).
# ----------------------------------------------------------------------------
def _make_attention_kernel(H, G, P, dk, norm):
    def kernel(qkv_ref, h_ref, wout_ref, o_ref):
        ridx = jax.lax.broadcasted_iota(jnp.int32, (G, 1), 0)   # hoisted out of head loop
        is_pick = (ridx >= 1) & (ridx <= P)
        is_node = ridx >= 1

        def dot_t(a, b):   # (m,k) x (n,k) -> (m,n)
            return jax.lax.dot_general(a, b, (((1,), (1,)), ((), ())),
                                       preferred_element_type=F32)

        def dot_n(a, b):   # (m,k) x (k,n) -> (m,n)
            return jax.lax.dot_general(a, b, (((1,), (0,)), ((), ())),
                                       preferred_element_type=F32)

        head_outs = []
        for hd in range(H):    # static unroll over heads (H is small)
            Q = qkv_ref[0, hd, 0]
            K = qkv_ref[1, hd, 0]
            V = qkv_ref[2, hd, 0]
            Q1 = qkv_ref[3, hd, 0]
            Q2 = qkv_ref[4, hd, 0]
            Q3 = qkv_ref[5, hd, 0]
            Q4 = qkv_ref[6, hd, 0]
            Q5 = qkv_ref[7, hd, 0]
            Q6 = qkv_ref[8, hd, 0]

            # sub-row loads (pick / delivery halves) straight from the ref
            Kp = qkv_ref[1, hd, 0, pl.ds(1, P), :]
            Kd = qkv_ref[1, hd, 0, pl.ds(P + 1, P), :]
            Vp = qkv_ref[2, hd, 0, pl.ds(1, P), :]
            Vd = qkv_ref[2, hd, 0, pl.ds(P + 1, P), :]
            Q1p = qkv_ref[3, hd, 0, pl.ds(1, P), :]      # W1-projected pickup rows
            Q4d = qkv_ref[6, hd, 0, pl.ds(P + 1, P), :]  # W4-projected delivery rows

            # Row-wise merged queries (pick rows <- W2/W3, delivery rows <- W6/W5)
            Qallp = jnp.where(is_pick, Q2, Q6)
            Qalld = jnp.where(is_pick, Q3, Q5)

            # Compatibilities
            C0 = norm * dot_t(Q, K)                                    # (G, G) graph
            Cp = jnp.where(is_node, norm * dot_t(Qallp, Kp), NEG)      # (G, P) vs all picks
            Cd = jnp.where(is_node, norm * dot_t(Qalld, Kd), NEG)      # (G, P) vs all deliveries

            # Paired pick<->delivery term: elementwise row-aligned dot (VPU), no matmul/mask
            cp_pick = norm * jnp.sum(Q1p * Kd, axis=-1, keepdims=True)  # (P, 1)
            cp_del = norm * jnp.sum(Q4d * Kp, axis=-1, keepdims=True)   # (P, 1)
            cpair = jnp.concatenate(
                [jnp.full((1, 1), NEG, F32), cp_pick, cp_del], axis=0)  # (G, 1)
            Vpair = jnp.concatenate(
                [jnp.zeros((1, dk), F32), Vd, Vp], axis=0)              # (G, dk)

            # softmax over the (virtual) concatenation [C0 | cpair | Cp | Cd]
            m = jnp.max(C0, axis=-1, keepdims=True)
            m = jnp.maximum(m, cpair)
            m = jnp.maximum(m, jnp.max(Cp, axis=-1, keepdims=True))
            m = jnp.maximum(m, jnp.max(Cd, axis=-1, keepdims=True))

            E0 = jnp.exp(C0 - m)
            Ep = jnp.exp(Cp - m)
            Ed = jnp.exp(Cd - m)
            ep = jnp.exp(cpair - m)

            denom = (jnp.sum(E0, -1, keepdims=True)
                     + jnp.sum(Ep, -1, keepdims=True)
                     + jnp.sum(Ed, -1, keepdims=True) + ep)
            num = dot_n(E0, V) + dot_n(Ep, Vp) + dot_n(Ed, Vd) + ep * Vpair
            head_outs.append(num * pl.reciprocal(denom, approx=True))

        heads_cat = jnp.concatenate(head_outs, axis=-1)     # (G, H*dk)
        mha = dot_n(heads_cat, wout_ref[...])               # (G, E) lane-dense output
        o_ref[0] = h_ref[0] + mha                           # fused SkipConnection(MHA)

    return kernel


def hetero_attention(qkv, h, wout_flat, norm):
    _, H, B, G, dk = qkv.shape
    E = h.shape[-1]
    P = (G - 1) // 2
    kernel = _make_attention_kernel(H, G, P, dk, norm)
    return pl.pallas_call(
        kernel,
        out_shape=jax.ShapeDtypeStruct((B, G, E), F32),
        grid=(B,),
        in_specs=[pl.BlockSpec((9, H, 1, G, dk), lambda b: (0, 0, b, 0, 0)),
                  pl.BlockSpec((1, G, E), lambda b: (b, 0, 0)),
                  pl.BlockSpec((H * dk, E), lambda b: (0, 0))],
        out_specs=pl.BlockSpec((1, G, E), lambda b: (b, 0, 0)),
        compiler_params=pltpu.CompilerParams(dimension_semantics=("parallel",)),
    )(qkv, h, wout_flat)


# ----------------------------------------------------------------------------
# Layer / encoder glue (reshapes & transposes in plain JAX, hot paths in Pallas)
# ----------------------------------------------------------------------------
def mha_layer(h, p, n_heads):
    B, G, E = h.shape
    dk = E // n_heads
    norm = 1.0 / math.sqrt(dk)
    M = B * G

    # 1) single wide GEMM for all 9 projections x all heads  (lane-dense N = 9*H*dk)
    qkv_flat = matmul(h.reshape(M, E), p['W_all'])                         # (M, 9*H*dk)
    qkv = qkv_flat.reshape(B, G, 9, n_heads, dk).transpose(2, 3, 0, 1, 4)  # (9,H,B,G,dk)

    # 2) heterogeneous attention + W_out + residual, grid over batch
    pre1 = hetero_attention(qkv, h, p['Wout_flat'], norm)                  # (B, G, E)

    # 3) BN1 + FF + residual + BN2 fused (batch statistics over all B*G rows)
    h2 = bn_ff_bn(pre1.reshape(M, E), p['bn1_g'], p['bn1_b'],
                  p['ff_W1'], p['ff_b1'], p['ff_W2'], p['ff_b2'],
                  p['bn2_g'], p['bn2_b']).reshape(B, G, E)
    return h2


def graph_attention_encoder(x, params, n_heads):
    B, G, node_dim = x.shape
    E = params['init_W'].shape[1]
    h = linear(x.reshape(-1, node_dim), params['init_W'],
               params['init_b']).reshape(B, G, E)
    for lp in params['layers']:
        h = mha_layer(h, lp, n_heads)
    return h, jnp.mean(h, axis=1)


# ----------------------------------------------------------------------------
# Deterministic parameter initialization (shapes matching the PyTorch __init__)
# ----------------------------------------------------------------------------
def init_params(key, n_heads, embed_dim, n_layers, node_dim, ff_hidden):
    dk = embed_dim // n_heads
    keys = iter(jax.random.split(key, 4 + n_layers * 20))

    def uni(shape, stdv):
        return jax.random.uniform(next(keys), shape, F32, -stdv, stdv)

    params = {
        'init_W': uni((node_dim, embed_dim), 1.0 / math.sqrt(node_dim)),
        'init_b': uni((1, embed_dim), 1.0 / math.sqrt(node_dim)),
        'layers': [],
    }
    sk = 1.0 / math.sqrt(dk)
    se = 1.0 / math.sqrt(embed_dim)
    for _ in range(n_layers):
        # 9 per-head projections (Wq, Wk, Wv, W1..W6), each (H, E, dk) like the PyTorch
        # parameters, fused into one (E, 9*H*dk) matrix for the single wide GEMM.
        w9 = jnp.stack([uni((n_heads, embed_dim, dk), sk) for _ in range(9)], axis=0)
        w_all = jnp.transpose(w9, (2, 0, 1, 3)).reshape(embed_dim, 9 * n_heads * dk)
        wout = uni((n_heads, dk, embed_dim), se)
        lp = {
            'W_all': w_all,
            'Wout_flat': wout.reshape(n_heads * dk, embed_dim),
            'bn1_g': jnp.ones((1, embed_dim), F32),
            'bn1_b': jnp.zeros((1, embed_dim), F32),
            'ff_W1': uni((embed_dim, ff_hidden), se),
            'ff_b1': uni((1, ff_hidden), se),
            'ff_W2': uni((ff_hidden, embed_dim), 1.0 / math.sqrt(ff_hidden)),
            'ff_b2': uni((1, embed_dim), 1.0 / math.sqrt(ff_hidden)),
            'bn2_g': jnp.ones((1, embed_dim), F32),
            'bn2_b': jnp.zeros((1, embed_dim), F32),
        }
        params['layers'].append(lp)
    return params


if __name__ == "__main__":
    # graph_size must be odd: depot + n_pick pickups + n_pick deliveries
    B, G, node_dim = 2, 9, 4
    n_heads, embed_dim, n_layers, ff_hidden = 2, 16, 2, 32

    key = jax.random.PRNGKey(0)
    pkey, xkey = jax.random.split(key)
    params = init_params(pkey, n_heads, embed_dim, n_layers, node_dim, ff_hidden)
    x = jax.random.normal(xkey, (B, G, node_dim), F32)

    h, h_mean = graph_attention_encoder(x, params, n_heads)
    jax.block_until_ready((h, h_mean))

    assert h.shape == (B, G, embed_dim)
    assert h_mean.shape == (B, embed_dim)
    assert bool(jnp.all(jnp.isfinite(h))) and bool(jnp.all(jnp.isfinite(h_mean)))
    print("KERNEL_OK")
</pallas_src>

<mosaic_0001>
module attributes {stable_mosaic.version = 11 : i64} {
  func.func @_linear_kernel(%arg0: i32, %arg1: memref<18x4xf32, #tpu.memory_space<vmem>>, %arg2: memref<4x16xf32, #tpu.memory_space<vmem>>, %arg3: memref<1x16xf32, #tpu.memory_space<vmem>>, %arg4: memref<18x16xf32, #tpu.memory_space<vmem>>) attributes {dimension_semantics = [#tpu.dimension_semantics<arbitrary>], iteration_bounds = array<i64: 1>, scalar_prefetch = 0 : i64, scratch_operands = 0 : i64, tpu.core_type = #tpu.core_type<tc>, window_params = [{pipeline_mode = #tpu.pipeline_mode<synchronous>, transform_indices = @transform_0, window_bounds = array<i64: 18, 4>}, {pipeline_mode = #tpu.pipeline_mode<synchronous>, transform_indices = @transform_1, window_bounds = array<i64: 4, 16>}, {pipeline_mode = #tpu.pipeline_mode<synchronous>, transform_indices = @transform_2, window_bounds = array<i64: 1, 16>}, {pipeline_mode = #tpu.pipeline_mode<synchronous>, transform_indices = @transform_3, window_bounds = array<i64: 18, 16>}]} {
    %c0 = arith.constant 0 : index
    %c0_0 = arith.constant 0 : index
    %0 = vector.load %arg1[%c0, %c0_0] : memref<18x4xf32, #tpu.memory_space<vmem>>, vector<18x4xf32>
    %c0_1 = arith.constant 0 : index
    %c0_2 = arith.constant 0 : index
    %1 = vector.load %arg2[%c0_1, %c0_2] : memref<4x16xf32, #tpu.memory_space<vmem>>, vector<4x16xf32>
    %cst = arith.constant dense<0.000000e+00> : vector<18x16xf32>
    %2 = tpu.matmul %0, %1, %cst {dimension_numbers = #tpu.dot_dimension_numbers<[1], [0], [0], [1], [0, 0, 1, 1], [], []>} : vector<18x4xf32>, vector<4x16xf32>, vector<18x16xf32> -> vector<18x16xf32>
    %c0_3 = arith.constant 0 : index
    %c0_4 = arith.constant 0 : index
    %3 = vector.load %arg3[%c0_3, %c0_4] : memref<1x16xf32, #tpu.memory_space<vmem>>, vector<1x16xf32>
    %4 = vector.broadcast %3 : vector<1x16xf32> to vector<18x16xf32>
    %5 = arith.addf %2, %4 : vector<18x16xf32>
    %c0_5 = arith.constant 0 : index
    %c0_6 = arith.constant 0 : index
    %6 = vector.load %arg4[%c0_5, %c0_6] : memref<18x16xf32, #tpu.memory_space<vmem>>, vector<18x16xf32>
    tpu.vector_store %arg4[%c0_5, %c0_6], %5 {strides = array<i32>} : memref<18x16xf32, #tpu.memory_space<vmem>>, vector<18x16xf32>,
    return
  }
  func.func @transform_0(%arg0: i32) -> (i32, i32) {
    %c0_i32 = arith.constant 0 : i32
    %c0_i32_0 = arith.constant 0 : i32
    %c0_i32_1 = arith.constant 0 : i32
    return %c0_i32, %c0_i32_0 : i32, i32
  }
  func.func @transform_1(%arg0: i32) -> (i32, i32) {
    %c0_i32 = arith.constant 0 : i32
    %c0_i32_0 = arith.constant 0 : i32
    %c0_i32_1 = arith.constant 0 : i32
    return %c0_i32, %c0_i32_0 : i32, i32
  }
  func.func @transform_2(%arg0: i32) -> (i32, i32) {
    %c0_i32 = arith.constant 0 : i32
    %c0_i32_0 = arith.constant 0 : i32
    %c0_i32_1 = arith.constant 0 : i32
    return %c0_i32, %c0_i32_0 : i32, i32
  }
  func.func @transform_3(%arg0: i32) -> (i32, i32) {
    %c0_i32 = arith.constant 0 : i32
    %c0_i32_0 = arith.constant 0 : i32
    %c0_i32_1 = arith.constant 0 : i32
    return %c0_i32, %c0_i32_0 : i32, i32
  }
}

</mosaic_0001>

<bundles_post_ra>
// kernel: tpu_custom_call.1
= control target key start
LH: loop header
LB: loop body
LE: loop exit
PB: predicated region body
PF: predicated region fallthrough
CT: control target
= control target key end

     0   :  { %vm35_vm0 = vcmask 1043456   ;;  %vm25_vm1 = vcmask 31744   ;;  %v152_v0 = vmov 0.0   ;;  %vm153_vm2 = vmmov 0   ;;  %s201_s1 = inlined_call_operand.vmem [shape: f32[4,16], index: 1, kind: input, shape index: {}]   ;;  %s202_s0 = inlined_call_operand.vmem [shape: f32[18,4], index: 0, kind: input, shape index: {}]   ;;  %s203_s2 = inlined_call_operand.vmem [shape: f32[1,16], index: 2, kind: input, shape index: {}]   ;;  %s204_s3 = inlined_call_operand.vmem [shape: f32[18,16], index: 3, kind: output, shape index: {}]  }
   0x1   :  { %148 = vmatprep.subr.mxu1 %v152_v0  ;;  %v17_v1 = vld [vmem:[%s201_s1] sm:$0xf]  ;;  %142 = vmatprep.mubr.msk.f32.mxu1 %vm153_vm2, %v152_v0  ;;  %v15_v2 = vld [vmem:[%s202_s0 + $0x8] sm:$0xff]  ;;  %v16_v4 = vld [vmem:[%s202_s0 + $0x10] sm:$0x3]  ;;  %vm119_vm3 = vcmask 130048  }
   0x2   :  { %149 = vmatpush3.msk.msra.mxu1 %vm35_vm0, %v17_v1  ;;  %137 = vmatprep.subr.mxu0 %v152_v0  ;;  %v14_v3 = vld [vmem:[%s202_s0] sm:$0xff]  ;;  %vm122_vm4 = vcmask 123904  }
   0x3   :  { %143 = vmatmul.mubr.msk.f32.vlgmr.msra.gmra.mrb[0].mxu1 %vm25_vm1, %v15_v2  ;;  %138 = vmatpush3.msk.msra.mxu0 %vm35_vm0, %v17_v1  ;;  %v128_v5 = vld [vmem:[%s203_s2] ss:$0 sm:$0xff] }
   0x4   :  { %139 = vmatprep.mubr.msk.f32.mxu0 %vm153_vm2, %v152_v0  ;;  %145 = vmatprep.mubr.msk.f32.mxu1 %vm153_vm2, %v152_v0 }
   0x5   :  { %140 = vmatmul.mubr.msk.f32.vlgmr.msra.gmra.mrb[0].mxu0 %vm25_vm1, %v14_v3 }
   0x7   :  { %146 = vmatmul.mubr.msk.f32.gmra.mrb[2].mxu1 %vm25_vm1, %v16_v4 }
  0xd6   :  { %v110_v6 = vpop.f32.mrb[0].mxu1 }
  0xd7   :  { %v111_v7 = vadd.f32 %v128_v5, %v110_v6  ;;  %v144_v8 = vpop.f32.mrb[1].mxu1 }
  0xd8   :  { %v105_v9 = vpop.f32.mrb[0].mxu0 }
  0xd9   :  { %121 = vst.msk [vmem:[%s204_s3 + $0x8] sm:$0xff] %vm119_vm3, %v111_v7  ;;  %v106_v10 = vadd.f32 %v128_v5, %v105_v9  ;;  %v141_v11 = vpop.f32.mrb[1].mxu0 }
  0xda   :  { %v115_v12 = vpop.f32.mrb[2].mxu1 }
  0xdb   :  { %120 = vst.msk [vmem:[%s204_s3] sm:$0xff] %vm119_vm3, %v106_v10  ;;  %v116_v13 = vadd.f32 %v128_v5, %v115_v12  ;;  %v147_v14 = vpop.f32.mrb[3].mxu1 }
  0xdd   :  { %123 = vst.msk [vmem:[%s204_s3 + $0x10] sm:$0x3] %vm122_vm4, %v116_v13 }

</bundles_post_ra>
